<compile_context>
chip_gen: v7x
topology: tpu7x:2x2x1
jax: 0.10.0
libtpu: 0.0.40
codegen_flags: <defaults>
</compile_context>

<pallas_src>
import functools

import jax
import jax.numpy as jnp
from jax import lax
from jax.experimental import pallas as pl
from jax.experimental.pallas import tpu as pltpu

HIDDEN = 10
LANES = 128
SUBLANES = 8
MIN_KERNEL_ELEMS = 1024          # below this a kernel launch isn't worth it
MIN_TILE_ROWS = 256              # blocks below ~256 rows fall off the v5e roofline
TARGET_GRID = 8                  # enough parallel tiles to load both v7x TensorCores


def _mlp_kernel(w1_ref, b1_ref, w2_ref, b2_ref, x_ref, o_ref):
    """Elementwise y = sum_j w2[j]*relu(w1[j]*x + b1[j]) + b2 over a
    (tile_rows, 128) lane-dense slab.  Pure VPU fma/max with SMEM scalar
    params; VALU is the binding slot, so no further DMA tuning is needed."""
    x = x_ref[...]

    # Accumulator seeded with the (once-per-tile, hoisted) b2 broadcast.
    acc0 = jnp.full(x.shape, b2_ref[0], dtype=jnp.float32)

    def body(j, acc):
        h = jnp.maximum(x * w1_ref[j] + b1_ref[j], 0.0)
        return acc + w2_ref[j] * h

    acc = lax.fori_loop(0, HIDDEN, body, acc0, unroll=True)
    o_ref[...] = acc.astype(o_ref.dtype)


def _mlp_pointwise(x, w1, b1, w2, b2):
    """Plain-XLA formula; used for tiny batches and ragged (<128 elem) tails."""
    h = jnp.maximum(x * w1[None, :] + b1[None, :], 0.0)       # (m, 10)
    return h @ w2[:, None] + b2[None, :]                       # (m, 1)


def _choose_tile_rows(rows, tile_rows):
    """Pick rows-per-block: large enough to amortize per-step overhead
    (>= 256 rows when possible), small enough that the parallel grid has
    several blocks so a v7x megacore can shard it across both TensorCores."""
    tr = min(tile_rows, rows)
    if rows >= 2 * MIN_TILE_ROWS:
        tr = min(tr, max(MIN_TILE_ROWS, pl.cdiv(rows, TARGET_GRID)))
    tr = max(SUBLANES, (tr // SUBLANES) * SUBLANES)
    return tr


@functools.partial(jax.jit, static_argnames=("tile_rows",))
def inverse_model_forward(x, w1, b1, w2, b2, *, tile_rows=2048):
    """Forward pass of InverseModel.

    x  : (N, 1) float32
    w1 : (10,)  float32   (fc1.weight.squeeze(-1))
    b1 : (10,)  float32   (fc1.bias)
    w2 : (10,)  float32   (fc2.weight.squeeze(0))
    b2 : (1,)   float32   (fc2.bias)
    returns (N, 1) float32
    """
    n = x.shape[0]
    if n < MIN_KERNEL_ELEMS:
        # Too small for a kernel launch to pay off; XLA fuses the 3-op formula.
        return _mlp_pointwise(x, w1, b1, w2, b2)

    n_main = (n // LANES) * LANES           # 128-aligned prefix handled in-kernel
    rows = n_main // LANES                  # >= 8 because n_main >= 1024
    tr = _choose_tile_rows(rows, tile_rows)
    grid = (pl.cdiv(rows, tr),)             # partial last block handled by Pallas

    flat = x.reshape(-1)
    # Free (bitcast) reshape when the whole batch is 128-aligned; otherwise a
    # prefix slice only — no whole-slab pad/unpad passes.
    slab = (flat if n_main == n else flat[:n_main]).reshape(rows, LANES)

    y_main = pl.pallas_call(
        _mlp_kernel,
        out_shape=jax.ShapeDtypeStruct((rows, LANES), jnp.float32),
        grid=grid,
        in_specs=[
            # Params: whole-array SMEM operands with a constant block index,
            # so the pipeline fetches them once, not per grid step.
            pl.BlockSpec(memory_space=pltpu.MemorySpace.SMEM),   # w1 (10,)
            pl.BlockSpec(memory_space=pltpu.MemorySpace.SMEM),   # b1 (10,)
            pl.BlockSpec(memory_space=pltpu.MemorySpace.SMEM),   # w2 (10,)
            pl.BlockSpec(memory_space=pltpu.MemorySpace.SMEM),   # b2 (1,)
            pl.BlockSpec((tr, LANES), lambda i: (i, 0)),          # x slab
        ],
        out_specs=pl.BlockSpec((tr, LANES), lambda i: (i, 0)),
        compiler_params=pltpu.CompilerParams(
            dimension_semantics=("parallel",),       # independent batch tiles
            vmem_limit_bytes=32 * 1024 * 1024,       # safe on v7x (64 MiB phys)
        ),
    )(w1, b1, w2, b2, slab)

    y_main = y_main.reshape(n_main, 1)
    if n_main == n:
        return y_main                        # zero extra HBM passes
    # Ragged tail (< 128 elements): plain XLA, then stitch.
    y_tail = _mlp_pointwise(x[n_main:], w1, b1, w2, b2)
    return jnp.concatenate([y_main, y_tail], axis=0)


def pure_jax_ref(x, w1, b1, w2, b2):
    # Mirrors nn.Linear(1,10) -> ReLU -> nn.Linear(10,1).
    h = jnp.maximum(x @ w1[None, :] + b1[None, :], 0.0)       # (N, 10)
    return h @ w2[:, None] + b2[None, :]                       # (N, 1)


if __name__ == "__main__":
    key = jax.random.PRNGKey(0)
    k_w1, k_b1, k_w2, k_b2, k_x1, k_x2, k_x3 = jax.random.split(key, 7)

    # Parameters (flat layout; equivalent to the PyTorch module's weights).
    w1 = jax.random.normal(k_w1, (HIDDEN,), dtype=jnp.float32) * 0.5
    b1 = jax.random.normal(k_b1, (HIDDEN,), dtype=jnp.float32) * 0.1
    w2 = jax.random.normal(k_w2, (HIDDEN,), dtype=jnp.float32) * 0.5
    b2 = jax.random.normal(k_b2, (1,), dtype=jnp.float32) * 0.1

    # 1) 128-aligned batch -> zero-copy kernel path (single tile).
    x1 = jax.random.normal(k_x1, (4096, 1), dtype=jnp.float32)
    out1 = jax.block_until_ready(inverse_model_forward(x1, w1, b1, w2, b2))
    assert out1.shape == (4096, 1)
    assert jnp.allclose(out1, pure_jax_ref(x1, w1, b1, w2, b2),
                        atol=1e-5, rtol=1e-5), "mismatch (aligned batch)"

    # 2) Ragged batch -> kernel on aligned prefix + XLA tail.
    x2 = jax.random.normal(k_x2, (4099, 1), dtype=jnp.float32)
    out2 = jax.block_until_ready(inverse_model_forward(x2, w1, b1, w2, b2))
    assert out2.shape == (4099, 1)
    assert jnp.allclose(out2, pure_jax_ref(x2, w1, b1, w2, b2),
                        atol=1e-5, rtol=1e-5), "mismatch (ragged batch)"

    # 3) Larger batch -> multi-tile parallel grid (megacore-shardable).
    x3 = jax.random.normal(k_x3, (65536, 1), dtype=jnp.float32)
    out3 = jax.block_until_ready(inverse_model_forward(x3, w1, b1, w2, b2))
    assert out3.shape == (65536, 1)
    assert jnp.allclose(out3, pure_jax_ref(x3, w1, b1, w2, b2),
                        atol=1e-5, rtol=1e-5), "mismatch (multi-tile batch)"

    # 4) Tiny batch -> fused-XLA fallback (no kernel launch).
    x4 = jnp.linspace(-1.0, 1.0, 8, dtype=jnp.float32).reshape(8, 1)
    out4 = jax.block_until_ready(inverse_model_forward(x4, w1, b1, w2, b2))
    assert out4.shape == (8, 1)
    assert jnp.allclose(out4, pure_jax_ref(x4, w1, b1, w2, b2),
                        atol=1e-5, rtol=1e-5), "mismatch (tiny batch)"

    print("KERNEL_OK")
</pallas_src>

<mosaic_0001>
module attributes {stable_mosaic.version = 11 : i64} {
  func.func @_mlp_kernel(%arg0: i32, %arg1: memref<10xf32, #tpu.memory_space<smem>>, %arg2: memref<10xf32, #tpu.memory_space<smem>>, %arg3: memref<10xf32, #tpu.memory_space<smem>>, %arg4: memref<1xf32, #tpu.memory_space<smem>>, %arg5: memref<32x128xf32, #tpu.memory_space<vmem>>, %arg6: memref<32x128xf32, #tpu.memory_space<vmem>>) attributes {dimension_semantics = [#tpu.dimension_semantics<parallel>], iteration_bounds = array<i64: 1>, scalar_prefetch = 0 : i64, scratch_operands = 0 : i64, tpu.core_type = #tpu.core_type<tc>, window_params = [{transform_indices = @transform_0, window_bounds = array<i64: 10>}, {transform_indices = @transform_1, window_bounds = array<i64: 10>}, {transform_indices = @transform_2, window_bounds = array<i64: 10>}, {transform_indices = @transform_3, window_bounds = array<i64: 1>}, {transform_indices = @transform_4, window_bounds = array<i64: 32, 128>}, {transform_indices = @transform_5, window_bounds = array<i64: 32, 128>}]} {
    %c0 = arith.constant 0 : index
    %c0_0 = arith.constant 0 : index
    %0 = vector.load %arg5[%c0, %c0_0] : memref<32x128xf32, #tpu.memory_space<vmem>>, vector<32x128xf32>
    %c0_1 = arith.constant 0 : index
    %1 = memref.load %arg4[%c0_1] : memref<1xf32, #tpu.memory_space<smem>>
    %2 = vector.broadcast %1 : f32 to vector<32x128xf32>
    %c0_i32 = arith.constant 0 : i32
    %3 = arith.index_cast %c0_i32 : i32 to index
    %4 = memref.load %arg1[%3] : memref<10xf32, #tpu.memory_space<smem>>
    %5 = vector.broadcast %4 : f32 to vector<32x128xf32>
    %6 = arith.mulf %0, %5 : vector<32x128xf32>
    %7 = arith.index_cast %c0_i32 : i32 to index
    %8 = memref.load %arg2[%7] : memref<10xf32, #tpu.memory_space<smem>>
    %9 = vector.broadcast %8 : f32 to vector<32x128xf32>
    %10 = arith.addf %6, %9 : vector<32x128xf32>
    %cst = arith.constant 0.000000e+00 : f32
    %11 = vector.broadcast %cst : f32 to vector<32x128xf32>
    %12 = arith.maximumf %10, %11 : vector<32x128xf32>
    %13 = arith.index_cast %c0_i32 : i32 to index
    %14 = memref.load %arg3[%13] : memref<10xf32, #tpu.memory_space<smem>>
    %15 = vector.broadcast %14 : f32 to vector<32x128xf32>
    %16 = arith.mulf %15, %12 : vector<32x128xf32>
    %17 = arith.addf %2, %16 : vector<32x128xf32>
    %c1_i32 = arith.constant 1 : i32
    %18 = arith.index_cast %c1_i32 : i32 to index
    %19 = memref.load %arg1[%18] : memref<10xf32, #tpu.memory_space<smem>>
    %20 = vector.broadcast %19 : f32 to vector<32x128xf32>
    %21 = arith.mulf %0, %20 : vector<32x128xf32>
    %22 = arith.index_cast %c1_i32 : i32 to index
    %23 = memref.load %arg2[%22] : memref<10xf32, #tpu.memory_space<smem>>
    %24 = vector.broadcast %23 : f32 to vector<32x128xf32>
    %25 = arith.addf %21, %24 : vector<32x128xf32>
    %cst_2 = arith.constant 0.000000e+00 : f32
    %26 = vector.broadcast %cst_2 : f32 to vector<32x128xf32>
    %27 = arith.maximumf %25, %26 : vector<32x128xf32>
    %28 = arith.index_cast %c1_i32 : i32 to index
    %29 = memref.load %arg3[%28] : memref<10xf32, #tpu.memory_space<smem>>
    %30 = vector.broadcast %29 : f32 to vector<32x128xf32>
    %31 = arith.mulf %30, %27 : vector<32x128xf32>
    %32 = arith.addf %17, %31 : vector<32x128xf32>
    %c2_i32 = arith.constant 2 : i32
    %33 = arith.index_cast %c2_i32 : i32 to index
    %34 = memref.load %arg1[%33] : memref<10xf32, #tpu.memory_space<smem>>
    %35 = vector.broadcast %34 : f32 to vector<32x128xf32>
    %36 = arith.mulf %0, %35 : vector<32x128xf32>
    %37 = arith.index_cast %c2_i32 : i32 to index
    %38 = memref.load %arg2[%37] : memref<10xf32, #tpu.memory_space<smem>>
    %39 = vector.broadcast %38 : f32 to vector<32x128xf32>
    %40 = arith.addf %36, %39 : vector<32x128xf32>
    %cst_3 = arith.constant 0.000000e+00 : f32
    %41 = vector.broadcast %cst_3 : f32 to vector<32x128xf32>
    %42 = arith.maximumf %40, %41 : vector<32x128xf32>
    %43 = arith.index_cast %c2_i32 : i32 to index
    %44 = memref.load %arg3[%43] : memref<10xf32, #tpu.memory_space<smem>>
    %45 = vector.broadcast %44 : f32 to vector<32x128xf32>
    %46 = arith.mulf %45, %42 : vector<32x128xf32>
    %47 = arith.addf %32, %46 : vector<32x128xf32>
    %c3_i32 = arith.constant 3 : i32
    %48 = arith.index_cast %c3_i32 : i32 to index
    %49 = memref.load %arg1[%48] : memref<10xf32, #tpu.memory_space<smem>>
    %50 = vector.broadcast %49 : f32 to vector<32x128xf32>
    %51 = arith.mulf %0, %50 : vector<32x128xf32>
    %52 = arith.index_cast %c3_i32 : i32 to index
    %53 = memref.load %arg2[%52] : memref<10xf32, #tpu.memory_space<smem>>
    %54 = vector.broadcast %53 : f32 to vector<32x128xf32>
    %55 = arith.addf %51, %54 : vector<32x128xf32>
    %cst_4 = arith.constant 0.000000e+00 : f32
    %56 = vector.broadcast %cst_4 : f32 to vector<32x128xf32>
    %57 = arith.maximumf %55, %56 : vector<32x128xf32>
    %58 = arith.index_cast %c3_i32 : i32 to index
    %59 = memref.load %arg3[%58] : memref<10xf32, #tpu.memory_space<smem>>
    %60 = vector.broadcast %59 : f32 to vector<32x128xf32>
    %61 = arith.mulf %60, %57 : vector<32x128xf32>
    %62 = arith.addf %47, %61 : vector<32x128xf32>
    %c4_i32 = arith.constant 4 : i32
    %63 = arith.index_cast %c4_i32 : i32 to index
    %64 = memref.load %arg1[%63] : memref<10xf32, #tpu.memory_space<smem>>
    %65 = vector.broadcast %64 : f32 to vector<32x128xf32>
    %66 = arith.mulf %0, %65 : vector<32x128xf32>
    %67 = arith.index_cast %c4_i32 : i32 to index
    %68 = memref.load %arg2[%67] : memref<10xf32, #tpu.memory_space<smem>>
    %69 = vector.broadcast %68 : f32 to vector<32x128xf32>
    %70 = arith.addf %66, %69 : vector<32x128xf32>
    %cst_5 = arith.constant 0.000000e+00 : f32
    %71 = vector.broadcast %cst_5 : f32 to vector<32x128xf32>
    %72 = arith.maximumf %70, %71 : vector<32x128xf32>
    %73 = arith.index_cast %c4_i32 : i32 to index
    %74 = memref.load %arg3[%73] : memref<10xf32, #tpu.memory_space<smem>>
    %75 = vector.broadcast %74 : f32 to vector<32x128xf32>
    %76 = arith.mulf %75, %72 : vector<32x128xf32>
    %77 = arith.addf %62, %76 : vector<32x128xf32>
    %c5_i32 = arith.constant 5 : i32
    %78 = arith.index_cast %c5_i32 : i32 to index
    %79 = memref.load %arg1[%78] : memref<10xf32, #tpu.memory_space<smem>>
    %80 = vector.broadcast %79 : f32 to vector<32x128xf32>
    %81 = arith.mulf %0, %80 : vector<32x128xf32>
    %82 = arith.index_cast %c5_i32 : i32 to index
    %83 = memref.load %arg2[%82] : memref<10xf32, #tpu.memory_space<smem>>
    %84 = vector.broadcast %83 : f32 to vector<32x128xf32>
    %85 = arith.addf %81, %84 : vector<32x128xf32>
    %cst_6 = arith.constant 0.000000e+00 : f32
    %86 = vector.broadcast %cst_6 : f32 to vector<32x128xf32>
    %87 = arith.maximumf %85, %86 : vector<32x128xf32>
    %88 = arith.index_cast %c5_i32 : i32 to index
    %89 = memref.load %arg3[%88] : memref<10xf32, #tpu.memory_space<smem>>
    %90 = vector.broadcast %89 : f32 to vector<32x128xf32>
    %91 = arith.mulf %90, %87 : vector<32x128xf32>
    %92 = arith.addf %77, %91 : vector<32x128xf32>
    %c6_i32 = arith.constant 6 : i32
    %93 = arith.index_cast %c6_i32 : i32 to index
    %94 = memref.load %arg1[%93] : memref<10xf32, #tpu.memory_space<smem>>
    %95 = vector.broadcast %94 : f32 to vector<32x128xf32>
    %96 = arith.mulf %0, %95 : vector<32x128xf32>
    %97 = arith.index_cast %c6_i32 : i32 to index
    %98 = memref.load %arg2[%97] : memref<10xf32, #tpu.memory_space<smem>>
    %99 = vector.broadcast %98 : f32 to vector<32x128xf32>
    %100 = arith.addf %96, %99 : vector<32x128xf32>
    %cst_7 = arith.constant 0.000000e+00 : f32
    %101 = vector.broadcast %cst_7 : f32 to vector<32x128xf32>
    %102 = arith.maximumf %100, %101 : vector<32x128xf32>
    %103 = arith.index_cast %c6_i32 : i32 to index
    %104 = memref.load %arg3[%103] : memref<10xf32, #tpu.memory_space<smem>>
    %105 = vector.broadcast %104 : f32 to vector<32x128xf32>
    %106 = arith.mulf %105, %102 : vector<32x128xf32>
    %107 = arith.addf %92, %106 : vector<32x128xf32>
    %c7_i32 = arith.constant 7 : i32
    %108 = arith.index_cast %c7_i32 : i32 to index
    %109 = memref.load %arg1[%108] : memref<10xf32, #tpu.memory_space<smem>>
    %110 = vector.broadcast %109 : f32 to vector<32x128xf32>
    %111 = arith.mulf %0, %110 : vector<32x128xf32>
    %112 = arith.index_cast %c7_i32 : i32 to index
    %113 = memref.load %arg2[%112] : memref<10xf32, #tpu.memory_space<smem>>
    %114 = vector.broadcast %113 : f32 to vector<32x128xf32>
    %115 = arith.addf %111, %114 : vector<32x128xf32>
    %cst_8 = arith.constant 0.000000e+00 : f32
    %116 = vector.broadcast %cst_8 : f32 to vector<32x128xf32>
    %117 = arith.maximumf %115, %116 : vector<32x128xf32>
    %118 = arith.index_cast %c7_i32 : i32 to index
    %119 = memref.load %arg3[%118] : memref<10xf32, #tpu.memory_space<smem>>
    %120 = vector.broadcast %119 : f32 to vector<32x128xf32>
    %121 = arith.mulf %120, %117 : vector<32x128xf32>
    %122 = arith.addf %107, %121 : vector<32x128xf32>
    %c8_i32 = arith.constant 8 : i32
    %123 = arith.index_cast %c8_i32 : i32 to index
    %124 = memref.load %arg1[%123] : memref<10xf32, #tpu.memory_space<smem>>
    %125 = vector.broadcast %124 : f32 to vector<32x128xf32>
    %126 = arith.mulf %0, %125 : vector<32x128xf32>
    %127 = arith.index_cast %c8_i32 : i32 to index
    %128 = memref.load %arg2[%127] : memref<10xf32, #tpu.memory_space<smem>>
    %129 = vector.broadcast %128 : f32 to vector<32x128xf32>
    %130 = arith.addf %126, %129 : vector<32x128xf32>
    %cst_9 = arith.constant 0.000000e+00 : f32
    %131 = vector.broadcast %cst_9 : f32 to vector<32x128xf32>
    %132 = arith.maximumf %130, %131 : vector<32x128xf32>
    %133 = arith.index_cast %c8_i32 : i32 to index
    %134 = memref.load %arg3[%133] : memref<10xf32, #tpu.memory_space<smem>>
    %135 = vector.broadcast %134 : f32 to vector<32x128xf32>
    %136 = arith.mulf %135, %132 : vector<32x128xf32>
    %137 = arith.addf %122, %136 : vector<32x128xf32>
    %c9_i32 = arith.constant 9 : i32
    %138 = arith.index_cast %c9_i32 : i32 to index
    %139 = memref.load %arg1[%138] : memref<10xf32, #tpu.memory_space<smem>>
    %140 = vector.broadcast %139 : f32 to vector<32x128xf32>
    %141 = arith.mulf %0, %140 : vector<32x128xf32>
    %142 = arith.index_cast %c9_i32 : i32 to index
    %143 = memref.load %arg2[%142] : memref<10xf32, #tpu.memory_space<smem>>
    %144 = vector.broadcast %143 : f32 to vector<32x128xf32>
    %145 = arith.addf %141, %144 : vector<32x128xf32>
    %cst_10 = arith.constant 0.000000e+00 : f32
    %146 = vector.broadcast %cst_10 : f32 to vector<32x128xf32>
    %147 = arith.maximumf %145, %146 : vector<32x128xf32>
    %148 = arith.index_cast %c9_i32 : i32 to index
    %149 = memref.load %arg3[%148] : memref<10xf32, #tpu.memory_space<smem>>
    %150 = vector.broadcast %149 : f32 to vector<32x128xf32>
    %151 = arith.mulf %150, %147 : vector<32x128xf32>
    %152 = arith.addf %137, %151 : vector<32x128xf32>
    %c10_i32 = arith.constant 10 : i32
    %c0_11 = arith.constant 0 : index
    %c0_12 = arith.constant 0 : index
    %153 = vector.load %arg6[%c0_11, %c0_12] : memref<32x128xf32, #tpu.memory_space<vmem>>, vector<32x128xf32>
    tpu.vector_store %arg6[%c0_11, %c0_12], %152 {strides = array<i32>} : memref<32x128xf32, #tpu.memory_space<vmem>>, vector<32x128xf32>,
    return
  }
  func.func @transform_0(%arg0: i32) -> i32 {
    %c0_i32 = arith.constant 0 : i32
    %c0_i32_0 = arith.constant 0 : i32
    return %c0_i32 : i32
  }
  func.func @transform_1(%arg0: i32) -> i32 {
    %c0_i32 = arith.constant 0 : i32
    %c0_i32_0 = arith.constant 0 : i32
    return %c0_i32 : i32
  }
  func.func @transform_2(%arg0: i32) -> i32 {
    %c0_i32 = arith.constant 0 : i32
    %c0_i32_0 = arith.constant 0 : i32
    return %c0_i32 : i32
  }
  func.func @transform_3(%arg0: i32) -> i32 {
    %c0_i32 = arith.constant 0 : i32
    %c0_i32_0 = arith.constant 0 : i32
    return %c0_i32 : i32
  }
  func.func @transform_4(%arg0: i32) -> (i32, i32) {
    %c0_i32 = arith.constant 0 : i32
    %c0_i32_0 = arith.constant 0 : i32
    return %arg0, %c0_i32 : i32, i32
  }
  func.func @transform_5(%arg0: i32) -> (i32, i32) {
    %c0_i32 = arith.constant 0 : i32
    %c0_i32_0 = arith.constant 0 : i32
    return %arg0, %c0_i32 : i32, i32
  }
}

</mosaic_0001>

<bundles_post_ra>
// kernel: inverse_model_forward.1
= control target key start
LH: loop header
LB: loop body
LE: loop exit
PB: predicated region body
PF: predicated region fallthrough
CT: control target
= control target key end

     0   :  { %11 = vsyncpa [#allocation6], 0  ;;  %s835_s0 = inlined_call_operand.vmem [shape: f32[10], index: 0, kind: input, shape index: {}]   ;;  %s836_s1 = inlined_call_operand.vmem [shape: f32[10], index: 1, kind: input, shape index: {}]   ;;  %s837_s2 = inlined_call_operand.vmem [shape: f32[10], index: 2, kind: input, shape index: {}]   ;;  %s838_s3 = inlined_call_operand.<no memory space> [shape: f32[1], index: 3, kind: input, shape index: {}]   ;;  %s839_s4 = inlined_call_operand.hbm [shape: f32[32,128], index: 4, kind: input, shape index: {}]   ;;  %s840_s5 = inlined_call_operand.hbm [shape: f32[32,128], index: 5, kind: output, shape index: {}]  }
   0x1   :  { %12 = vsyncpa [#allocation8], 0 }
   0x2   :  { %13 = vsyncpa [#allocation4], 0  ;;  %s31_s20 = sshll.u32 %s836_s1, 4  ;;  %s32_s20 = int_to_ptr.vmem [resolvable:$true] %s31_s20 }
   0x3   :  { %14 = vsyncpa [#allocation5], 0  ;;  %s21_s23 = sshll.u32 %s835_s0, 4  ;;  %s395_s24 = scalar_lea.vmem %s32_s20, 16  ;;  %s22_s23 = int_to_ptr.vmem [resolvable:$true] %s21_s23 }
   0x4   :  { %p396_p0 = scmp.ne.s32.totalorder %s32_s20, %s395_s24  ;;  %p400_p1 = scmp.lt.s32.totalorder %s32_s20, %s32_s20 }
   0x5   :  { %p401_p2 = scmp.lt.s32.totalorder %s395_s24, %s395_s24 }
   0x7   :  { %p402_p3 = por %p401_p2, %p400_p1 }
   0x9   :  { %p403_p4 = pnand %p402_p3, %p396_p0 }
   0xb   :  { %406 = shalt.err (!%p403_p4)
}
   0xc   :  { %s483_s25 = smov [#allocation7]   ;;  %s407_s26 = scalar_lea.vmem %s22_s23, 16 }
   0xd   :  { %34 = dma.vmem_to_smem %s32_s20, 16, %s483_s25, [#allocation8]  }
   0xe   :  { %p408_p5 = scmp.ne.s32.totalorder %s22_s23, %s407_s26  ;;  %p412_p6 = scmp.lt.s32.totalorder %s22_s23, %s22_s23 }
   0xf   :  { %p413_p7 = scmp.lt.s32.totalorder %s407_s26, %s407_s26 }
  0x11   :  { %p414_p8 = por %p413_p7, %p412_p6 }
  0x13   :  { %p415_p9 = pnand %p414_p8, %p408_p5 }
  0x15   :  { %418 = shalt.err (!%p415_p9)
}
  0x16   :  { %s484_s1 = smov [#allocation3]   ;;  %s41_s28 = sshll.u32 %s837_s2, 4  ;;  %s42_s28 = int_to_ptr.vmem [resolvable:$true] %s41_s28 }
  0x17   :  { %24 = dma.vmem_to_smem %s22_s23, 16, %s484_s1, [#allocation6]  }
  0x18   :  { %s419_s29 = scalar_lea.vmem %s42_s28, 16  ;;  %p424_p11 = scmp.lt.s32.totalorder %s42_s28, %s42_s28 }
  0x19   :  { %p420_p10 = scmp.ne.s32.totalorder %s42_s28, %s419_s29  ;;  %p425_p12 = scmp.lt.s32.totalorder %s419_s29, %s419_s29 }
  0x1b   :  { %p426_p13 = por %p425_p12, %p424_p11 }
  0x1d   :  { %p427_p0 = pnand %p426_p13, %p420_p10 }
  0x1f   :  { %430 = shalt.err (!%p427_p0)
}
  0x20   :  { %s485_s30 = smov [#allocation9]   ;;  %s486_s6 = smov [#allocation10]  }
  0x21   :  { %44 = dma.vmem_to_smem %s42_s28, 16, %s485_s30, [#allocation8]  }
  0x22   :  { %s52_s7 = sshll.u32 %s486_s6, 4  ;;  %s431_s10 = scalar_lea.hbm %s839_s4, 512  ;;  %s53_s7 = int_to_ptr.vmem [resolvable:$true] %s52_s7 }
  0x23   :  { %p432_p1 = scmp.ne.s32.totalorder %s839_s4, %s431_s10  ;;  %p435_p2 = scmp.lt.u32.totalorder %s431_s10, %s839_s4 }
  0x25   :  { %p437_p3 = pnand %p435_p2, %p432_p1 }
  0x27   :  { %440 = shalt.err (!%p437_p3)
}
  0x28   :  { %s441_s14 = scalar_lea.vmem %s53_s7, 512  ;;  %p446_p5 = scmp.lt.s32.totalorder %s53_s7, %s53_s7 }
  0x29   :  { %p442_p4 = scmp.ne.s32.totalorder %s53_s7, %s441_s14  ;;  %p447_p6 = scmp.lt.s32.totalorder %s441_s14, %s441_s14 }
  0x2b   :  { %p448_p7 = por %p447_p6, %p446_p5 }
  0x2d   :  { %p449_p8 = pnand %p448_p7, %p442_p4 }
  0x2f   :  { %452 = shalt.err (!%p449_p8)
}
  0x30   :  { %s487_s15 = smov 128   ;;  %s488_s16 = smov 8  }
  0x31   :  { %58 = dma.hbm_to_vmem [thread:$0]  %s839_s4, 512, %s53_s7, [#allocation4], %s487_s15, %s487_s15, %s488_s16  }
  0x32   :  { %475 = dma.done.wait [#allocation6], 16  }
  0x33   :  { %476 = vsyncadd [#allocation6], 4294967280 }
  0x34   :  { %477 = dma.done.wait [#allocation8], 32  }
  0x35   :  { %478 = vsyncadd [#allocation8], 4294967264 }
  0x36   :  { %479 = dma.done.wait [#allocation4], 512  }
  0x37   :  { %480 = vsyncadd [#allocation4], 4294966784 }
  0x38   :  { %71 = sfence }
  0x39   :  { %s78_s19 = sld [smem:[#allocation3]]  ;;  %s361_s22 = sld [smem:[#allocation3 + $0x1]]  ;;  %v544_v0 = vld [vmem:[#allocation10] sm:$0xff]  ;;  %v546_v1 = vld [vmem:[#allocation10 + $0x8] sm:$0xff]  ;;  %v555_v2 = vstv %s838_s3 }
  0x3a   :  { %s84_s20 = sld [smem:[#allocation7]]  ;;  %s362_s23 = sld [smem:[#allocation7 + $0x1]] }
  0x3b   :  { %s94_s21 = sld [smem:[#allocation9]]  ;;  %s363_s24 = sld [smem:[#allocation9 + $0x1]] }
  0x3c   :  { %s364_s25 = sld [smem:[#allocation3 + $0x2]]  ;;  %s367_s0 = sld [smem:[#allocation3 + $0x3]] }
  0x3d   :  { %s365_s26 = sld [smem:[#allocation7 + $0x2]]  ;;  %s548_s4 = sld [smem:[#allocation7 + $0x3]] }
  0x3e   :  { %s366_s1 = sld [smem:[#allocation9 + $0x2]]  ;;  %s550_s27 = sld [smem:[#allocation9 + $0x3]] }
  0x3f   :  { %v557_v3 = vstv %s78_s19  ;;  %s561_s30 = sld [smem:[#allocation3 + $0x4]]  ;;  %v569_v7 = vstv %s361_s22  ;;  %s573_s8 = sld [smem:[#allocation3 + $0x5]] }
  0x40   :  { %v559_v4 = vstv %s84_s20  ;;  %s563_s6 = sld [smem:[#allocation7 + $0x4]]  ;;  %v80_v5 = vmul.f32 %v557_v3, %v544_v0  ;;  %v81_v8 = vmul.f32 %v557_v3, %v546_v1  ;;  %v106_v9 = vmul.f32 %v569_v7, %v544_v0  ;;  %s583_s3 = sld [smem:[#allocation7 + $0x5]] }
  0x41   :  { %v567_v6 = vstv %s94_s21  ;;  %s571_s7 = sld [smem:[#allocation9 + $0x4]]  ;;  %v579_v10 = vstv %s362_s23  ;;  %v581_v11 = vstv %s363_s24  ;;  %s585_s9 = sld [smem:[#allocation9 + $0x5]]  ;;  %v589_v12 = vmul.f32 %v569_v7, %v546_v1 }
  0x42   :  { %v86_v13 = vadd.f32 %v559_v4, %v80_v5  ;;  %v592_v14 = vstv %s364_s25  ;;  %s596_s10 = sld [smem:[#allocation3 + $0x6]]  ;;  %v601_v16 = vadd.f32 %v559_v4, %v81_v8  ;;  %v112_v17 = vadd.f32 %v579_v10, %v106_v9  ;;  %s612_s2 = sld [smem:[#allocation3 + $0x7]] }
  0x43   :  { %v594_v15 = vstv %s365_s26  ;;  %s598_s11 = sld [smem:[#allocation7 + $0x6]]  ;;  %v132_v18 = vmul.f32 %v592_v14, %v544_v0  ;;  %v608_v20 = vstv %s367_s0  ;;  %v617_v23 = vstv %s548_s4  ;;  %s622_s13 = sld [smem:[#allocation7 + $0x7]] }
  0x44   :  { %v606_v19 = vstv %s366_s1  ;;  %s610_s12 = sld [smem:[#allocation9 + $0x6]]  ;;  %v90_v21 = vmax.f32 %v86_v13, 0.0  ;;  %v158_v22 = vmul.f32 %v608_v20, %v544_v0  ;;  %v620_v24 = vstv %s550_s27  ;;  %s624_s14 = sld [smem:[#allocation9 + $0x7]] }
  0x45   :  { %v116_v25 = vmax.f32 %v112_v17, 0.0  ;;  %v138_v26 = vadd.f32 %v594_v15, %v132_v18  ;;  %v628_v27 = vstv %s561_s30  ;;  %s633_s17 = sld [smem:[#allocation3 + $0x8]]  ;;  %v648_v35 = vstv %s573_s8  ;;  %s653_s20 = sld [smem:[#allocation3 + $0x9]] }
  0x46   :  { %v631_v28 = vstv %s563_s6  ;;  %s635_s18 = sld [smem:[#allocation7 + $0x8]]  ;;  %v96_v29 = vmul.f32 %v567_v6, %v90_v21  ;;  %v164_v30 = vadd.f32 %v617_v23, %v158_v22  ;;  %v184_v31 = vmul.f32 %v628_v27, %v544_v0  ;;  %s655_s21 = sld [smem:[#allocation7 + $0x9]] }
  0x47   :  { %v642_v32 = vstv %s571_s7  ;;  %s644_s19 = sld [smem:[#allocation9 + $0x8]]  ;;  %v122_v33 = vmul.f32 %v581_v11, %v116_v25  ;;  %v142_v34 = vmax.f32 %v138_v26, 0.0  ;;  %v651_v36 = vstv %s583_s3  ;;  %s387_s22 = sld [smem:[#allocation9 + $0x9]] }
  0x48   :  { %v100_v37 = vadd.f32 %v96_v29, %v555_v2  ;;  %v168_v38 = vmax.f32 %v164_v30, 0.0  ;;  %v190_v39 = vadd.f32 %v631_v28, %v184_v31  ;;  %v210_v40 = vmul.f32 %v648_v35, %v544_v0  ;;  %s489_s23 = smov [#allocation11]  }
  0x49   :  { %v148_v41 = vmul.f32 %v606_v19, %v142_v34  ;;  %v663_v42 = vstv %s585_s9  ;;  %v666_v43 = vstv %s596_s10  ;;  %v669_v44 = vstv %s598_s11  ;;  %s347_s24 = sshll.u32 %s489_s23, 4  ;;  %s348_s24 = int_to_ptr.vmem [resolvable:$true] %s347_s24 }
  0x4a   :  { %v126_v45 = vadd.f32 %v122_v33, %v100_v37  ;;  %v174_v46 = vmul.f32 %v620_v24, %v168_v38  ;;  %v194_v47 = vmax.f32 %v190_v39, 0.0  ;;  %v216_v48 = vadd.f32 %v651_v36, %v210_v40  ;;  %s453_s25 = scalar_lea.vmem %s348_s24, 512  ;;  %p458_p10 = scmp.lt.s32.totalorder %s348_s24, %s348_s24 }
  0x4b   :  { %v236_v49 = vmul.f32 %v666_v43, %v544_v0  ;;  %v676_v50 = vstv %s610_s12  ;;  %v679_v51 = vstv %s612_s2  ;;  %v682_v52 = vstv %s622_s13  ;;  %p454_p9 = scmp.ne.s32.totalorder %s348_s24, %s453_s25  ;;  %p459_p11 = scmp.lt.s32.totalorder %s453_s25, %s453_s25 }
  0x4c   :  { %v152_v53 = vadd.f32 %v148_v41, %v126_v45  ;;  %v200_v54 = vmul.f32 %v642_v32, %v194_v47  ;;  %v220_v55 = vmax.f32 %v216_v48, 0.0  ;;  %v262_v56 = vmul.f32 %v679_v51, %v544_v0 }
  0x4d   :  { %v242_v57 = vadd.f32 %v669_v44, %v236_v49  ;;  %v689_v58 = vstv %s624_s14  ;;  %v692_v59 = vstv %s633_s17  ;;  %v695_v60 = vstv %s635_s18  ;;  %p460_p12 = por %p459_p11, %p458_p10 }
  0x4e   :  { %v178_v61 = vadd.f32 %v174_v46, %v152_v53  ;;  %v226_v62 = vmul.f32 %v663_v42, %v220_v55  ;;  %v268_v63 = vadd.f32 %v682_v52, %v262_v56  ;;  %v288_v5 = vmul.f32 %v692_v59, %v544_v0 }
  0x4f   :  { %v246_v8 = vmax.f32 %v242_v57, 0.0  ;;  %v702_v9 = vstv %s644_s19  ;;  %v705_v13 = vstv %s653_s20  ;;  %v708_v17 = vstv %s655_s21  ;;  %p461_p13 = pnand %p460_p12, %p454_p9 }
  0x50   :  { %v204_v18 = vadd.f32 %v200_v54, %v178_v61  ;;  %v272_v21 = vmax.f32 %v268_v63, 0.0  ;;  %v294_v22 = vadd.f32 %v695_v60, %v288_v5  ;;  %v314_v25 = vmul.f32 %v705_v13, %v544_v0 }
  0x51   :  { %v252_v26 = vmul.f32 %v676_v50, %v246_v8  ;;  %v714_v29 = vstv %s387_s22  ;;  %v91_v30 = vmax.f32 %v601_v16, 0.0  ;;  %v113_v31 = vadd.f32 %v579_v10, %v589_v12 }
  0x52   :  { %v230_v33 = vadd.f32 %v226_v62, %v204_v18  ;;  %v278_v34 = vmul.f32 %v689_v58, %v272_v21  ;;  %v298_v37 = vmax.f32 %v294_v22, 0.0  ;;  %v320_v38 = vadd.f32 %v708_v17, %v314_v25 }
  0x53   :  { %v97_v39 = vmul.f32 %v567_v6, %v91_v30  ;;  %v117_v40 = vmax.f32 %v113_v31, 0.0  ;;  %v133_v0 = vmul.f32 %v592_v14, %v546_v1  ;;  %v159_v41 = vmul.f32 %v608_v20, %v546_v1 }
  0x54   :  { %v256_v45 = vadd.f32 %v252_v26, %v230_v33  ;;  %v304_v16 = vmul.f32 %v702_v9, %v298_v37  ;;  %v324_v46 = vmax.f32 %v320_v38, 0.0  ;;  %v185_v12 = vmul.f32 %v628_v27, %v546_v1  ;;  %v74_v33 = vld [vmem:[#allocation10 + $0x10] sm:$0xff] }
  0x55   :  { %v101_v47 = vadd.f32 %v97_v39, %v555_v2  ;;  %v123_v48 = vmul.f32 %v581_v11, %v117_v40  ;;  %v139_v49 = vadd.f32 %v594_v15, %v133_v0  ;;  %v165_v53 = vadd.f32 %v617_v23, %v159_v41 }
  0x56   :  { %v282_v54 = vadd.f32 %v278_v34, %v256_v45  ;;  %v330_v55 = vmul.f32 %v714_v29, %v324_v46  ;;  %v191_v56 = vadd.f32 %v631_v28, %v185_v12  ;;  %v211_v57 = vmul.f32 %v648_v35, %v546_v1 }
  0x57   :  { %v127_v61 = vadd.f32 %v123_v48, %v101_v47  ;;  %v143_v62 = vmax.f32 %v139_v49, 0.0  ;;  %v169_v63 = vmax.f32 %v165_v53, 0.0  ;;  %v237_v5 = vmul.f32 %v666_v43, %v546_v1 }
  0x58   :  { %v308_v8 = vadd.f32 %v304_v16, %v282_v54  ;;  %v195_v18 = vmax.f32 %v191_v56, 0.0  ;;  %v217_v21 = vadd.f32 %v651_v36, %v211_v57  ;;  %v263_v22 = vmul.f32 %v679_v51, %v546_v1 }
  0x59   :  { %v149_v25 = vmul.f32 %v606_v19, %v143_v62  ;;  %v175_v26 = vmul.f32 %v620_v24, %v169_v63  ;;  %v243_v30 = vadd.f32 %v669_v44, %v237_v5  ;;  %v289_v31 = vmul.f32 %v692_v59, %v546_v1 }
  0x5a   :  { %v334_v34 = vadd.f32 %v330_v55, %v308_v8  ;;  %v201_v37 = vmul.f32 %v642_v32, %v195_v18  ;;  %v221_v38 = vmax.f32 %v217_v21, 0.0  ;;  %v269_v39 = vadd.f32 %v682_v52, %v263_v22 }
  0x5b   :  { %v153_v40 = vadd.f32 %v149_v25, %v127_v61  ;;  %v247_v0 = vmax.f32 %v243_v30, 0.0  ;;  %v295_v41 = vadd.f32 %v695_v60, %v289_v31  ;;  %v315_v45 = vmul.f32 %v705_v13, %v546_v1 }
  0x5c   :  { %338 = vst [vmem:[#allocation11] sm:$0xff] %v334_v34  ;;  %v273_v16 = vmax.f32 %v269_v39, 0.0  ;;  %v82_v46 = vmul.f32 %v557_v3, %v74_v33  ;;  %v108_v12 = vmul.f32 %v569_v7, %v74_v33  ;;  %v227_v48 = vmul.f32 %v663_v42, %v221_v38 }
  0x5d   :  { %v179_v47 = vadd.f32 %v175_v26, %v153_v40  ;;  %v299_v49 = vmax.f32 %v295_v41, 0.0  ;;  %v321_v53 = vadd.f32 %v708_v17, %v315_v45  ;;  %v253_v54 = vmul.f32 %v676_v50, %v247_v0 }
  0x5e   :  { %v88_v55 = vadd.f32 %v559_v4, %v82_v46  ;;  %v114_v56 = vadd.f32 %v579_v10, %v108_v12  ;;  %v134_v1 = vmul.f32 %v592_v14, %v74_v33  ;;  %v279_v61 = vmul.f32 %v689_v58, %v273_v16 }
  0x5f   :  { %v205_v57 = vadd.f32 %v201_v37, %v179_v47  ;;  %v305_v62 = vmul.f32 %v702_v9, %v299_v49  ;;  %v160_v63 = vmul.f32 %v608_v20, %v74_v33  ;;  %v186_v21 = vmul.f32 %v628_v27, %v74_v33 }
  0x60   :  { %v92_v5 = vmax.f32 %v88_v55, 0.0  ;;  %v118_v8 = vmax.f32 %v114_v56, 0.0  ;;  %v140_v18 = vadd.f32 %v594_v15, %v134_v1  ;;  %v325_v25 = vmax.f32 %v321_v53, 0.0  ;;  %v75_v55 = vld [vmem:[#allocation10 + $0x18] sm:$0xff] }
  0x61   :  { %v231_v22 = vadd.f32 %v227_v48, %v205_v57  ;;  %v166_v26 = vadd.f32 %v617_v23, %v160_v63  ;;  %v212_v30 = vmul.f32 %v648_v35, %v74_v33  ;;  %v192_v38 = vadd.f32 %v631_v28, %v186_v21 }
  0x62   :  { %v98_v31 = vmul.f32 %v567_v6, %v92_v5  ;;  %v124_v34 = vmul.f32 %v581_v11, %v118_v8  ;;  %v144_v37 = vmax.f32 %v140_v18, 0.0  ;;  %v238_v41 = vmul.f32 %v666_v43, %v74_v33 }
  0x63   :  { %v257_v39 = vadd.f32 %v253_v54, %v231_v22  ;;  %v170_v40 = vmax.f32 %v166_v26, 0.0  ;;  %v218_v0 = vadd.f32 %v651_v36, %v212_v30  ;;  %v196_v46 = vmax.f32 %v192_v38, 0.0 }
  0x64   :  { %v102_v45 = vadd.f32 %v98_v31, %v555_v2  ;;  %v150_v16 = vmul.f32 %v606_v19, %v144_v37  ;;  %v264_v12 = vmul.f32 %v679_v51, %v74_v33  ;;  %v331_v48 = vmul.f32 %v714_v29, %v325_v25 }
  0x65   :  { %v283_v47 = vadd.f32 %v279_v61, %v257_v39  ;;  %v222_v49 = vmax.f32 %v218_v0, 0.0  ;;  %v244_v53 = vadd.f32 %v669_v44, %v238_v41  ;;  %v176_v56 = vmul.f32 %v620_v24, %v170_v40 }
  0x66   :  { %v128_v54 = vadd.f32 %v124_v34, %v102_v45  ;;  %v270_v1 = vadd.f32 %v682_v52, %v264_v12  ;;  %v290_v57 = vmul.f32 %v692_v59, %v74_v33  ;;  %v202_v5 = vmul.f32 %v642_v32, %v196_v46 }
  0x67   :  { %v309_v63 = vadd.f32 %v305_v62, %v283_v47  ;;  %v248_v8 = vmax.f32 %v244_v53, 0.0  ;;  %v316_v18 = vmul.f32 %v705_v13, %v74_v33  ;;  %v83_v25 = vmul.f32 %v557_v3, %v75_v55 }
  0x68   :  { %v154_v61 = vadd.f32 %v150_v16, %v128_v54  ;;  %v274_v21 = vmax.f32 %v270_v1, 0.0  ;;  %v296_v22 = vadd.f32 %v695_v60, %v290_v57  ;;  %v228_v30 = vmul.f32 %v663_v42, %v222_v49 }
  0x69   :  { %v335_v26 = vadd.f32 %v331_v48, %v309_v63  ;;  %v322_v31 = vadd.f32 %v708_v17, %v316_v18  ;;  %v109_v34 = vmul.f32 %v569_v7, %v75_v55  ;;  %v254_v62 = vmul.f32 %v676_v50, %v248_v8 }
  0x6a   :  { %v180_v37 = vadd.f32 %v176_v56, %v154_v61  ;;  %v300_v38 = vmax.f32 %v296_v22, 0.0  ;;  %v89_v39 = vadd.f32 %v559_v4, %v83_v25  ;;  %v280_v33 = vmul.f32 %v689_v58, %v274_v21 }
  0x6b   :  { %339 = vst [vmem:[#allocation11 + $0x8] sm:$0xff] %v335_v26  ;;  %v115_v40 = vadd.f32 %v579_v10, %v109_v34  ;;  %v135_v3 = vmul.f32 %v592_v14, %v75_v55  ;;  %v161_v0 = vmul.f32 %v608_v20, %v75_v55  ;;  %v326_v45 = vmax.f32 %v322_v31, 0.0 }
  0x6c   :  { %v206_v41 = vadd.f32 %v202_v5, %v180_v37  ;;  %v93_v16 = vmax.f32 %v89_v39, 0.0  ;;  %v187_v7 = vmul.f32 %v628_v27, %v75_v55  ;;  %v306_v46 = vmul.f32 %v702_v9, %v300_v38 }
  0x6d   :  { %v119_v12 = vmax.f32 %v115_v40, 0.0  ;;  %v141_v47 = vadd.f32 %v594_v15, %v135_v3  ;;  %v167_v4 = vadd.f32 %v617_v23, %v161_v0  ;;  %v213_v14 = vmul.f32 %v648_v35, %v75_v55 }
  0x6e   :  { %v232_v48 = vadd.f32 %v228_v30, %v206_v41  ;;  %v99_v49 = vmul.f32 %v567_v6, %v93_v16  ;;  %v193_v10 = vadd.f32 %v631_v28, %v187_v7  ;;  %v239_v27 = vmul.f32 %v666_v43, %v75_v55 }
  0x6f   :  { %v125_v20 = vmul.f32 %v581_v11, %v119_v12  ;;  %v145_v53 = vmax.f32 %v141_v47, 0.0  ;;  %v171_v54 = vmax.f32 %v167_v4, 0.0  ;;  %v219_v15 = vadd.f32 %v651_v36, %v213_v14 }
  0x70   :  { %v258_v56 = vadd.f32 %v254_v62, %v232_v48  ;;  %v103_v1 = vadd.f32 %v99_v49, %v555_v2  ;;  %v197_v57 = vmax.f32 %v193_v10, 0.0  ;;  %v332_v23 = vmul.f32 %v714_v29, %v326_v45 }
  0x71   :  { %v151_v6 = vmul.f32 %v606_v19, %v145_v53  ;;  %v245_v28 = vadd.f32 %v669_v44, %v239_v27  ;;  %v265_v35 = vmul.f32 %v679_v51, %v75_v55  ;;  %v177_v5 = vmul.f32 %v620_v24, %v171_v54 }
  0x72   :  { %v284_v63 = vadd.f32 %v280_v33, %v258_v56  ;;  %v129_v11 = vadd.f32 %v125_v20, %v103_v1  ;;  %v223_v8 = vmax.f32 %v219_v15, 0.0  ;;  %v291_v2 = vmul.f32 %v692_v59, %v75_v55 }
  0x73   :  { %v271_v43 = vadd.f32 %v682_v52, %v265_v35  ;;  %v317_v18 = vmul.f32 %v705_v13, %v75_v55  ;;  %v203_v21 = vmul.f32 %v642_v32, %v197_v57  ;;  %v249_v19 = vmax.f32 %v245_v28, 0.0 }
  0x74   :  { %v310_v36 = vadd.f32 %v306_v46, %v284_v63  ;;  %v155_v61 = vadd.f32 %v151_v6, %v129_v11  ;;  %v229_v44 = vmul.f32 %v663_v42, %v223_v8  ;;  %v297_v51 = vadd.f32 %v695_v60, %v291_v2 }
  0x75   :  { %v275_v26 = vmax.f32 %v271_v43, 0.0  ;;  %v323_v24 = vadd.f32 %v708_v17, %v317_v18  ;;  %v255_v59 = vmul.f32 %v676_v50, %v249_v19 }
  0x76   :  { %v336_v22 = vadd.f32 %v332_v23, %v310_v36  ;;  %v181_v25 = vadd.f32 %v177_v5, %v155_v61  ;;  %v301_v30 = vmax.f32 %v297_v51, 0.0 }
  0x77   :  { %v281_v55 = vmul.f32 %v689_v58, %v275_v26  ;;  %v327_v31 = vmax.f32 %v323_v24, 0.0 }
  0x78   :  { %340 = vst [vmem:[#allocation11 + $0x10] sm:$0xff] %v336_v22  ;;  %v207_v52 = vadd.f32 %v203_v21, %v181_v25  ;;  %v307_v34 = vmul.f32 %v702_v9, %v301_v30 }
  0x79   :  { %v333_v60 = vmul.f32 %v714_v29, %v327_v31 }
  0x7a   :  { %v233_v13 = vadd.f32 %v229_v44, %v207_v52 }
  0x7c   :  { %v259_v32 = vadd.f32 %v255_v59, %v233_v13 }
  0x7e   :  { %v285_v42 = vadd.f32 %v281_v55, %v259_v32 }
  0x80   :  { %v311_v37 = vadd.f32 %v307_v34, %v285_v42 }
  0x82   :  { %v337_v62 = vadd.f32 %v333_v60, %v311_v37 }
  0x84   :  { %341 = vst [vmem:[#allocation11 + $0x18] sm:$0xff] %v337_v62 }
  0x85   :  { %464 = shalt.err (!%p461_p13)
}
  0x86   :  { %s465_s0 = scalar_lea.hbm %s840_s5, 512 }
  0x87   :  { %p466_p0 = scmp.ne.s32.totalorder %s840_s5, %s465_s0  ;;  %p469_p1 = scmp.lt.u32.totalorder %s465_s0, %s840_s5 }
  0x89   :  { %p471_p2 = pnand %p469_p1, %p466_p0 }
  0x8b   :  { %474 = shalt.err (!%p471_p2)
}
  0x8c   :  { %353 = dma.vmem_to_hbm [thread:$0]  %s348_s24, 512, %s840_s5, [#allocation5], %s487_s15, %s487_s15, %s488_s16  }
  0x8d   :  { %481 = dma.done.wait [#allocation5], 512  }
  0x8e   :  { %482 = vsyncadd [#allocation5], 4294966784 }
  0x8f   :  { %357 = vsyncpa [#allocation4], 1 }
  0x90   :  { %358 = vsyncpa [#allocation5], 1 }
  0x91   :  { %359 = vsyncpa [#allocation6], 1 }
  0x92   :  { %360 = vsyncpa [#allocation8], 1 }

</bundles_post_ra>
